<compile_context>
chip_gen: v5e
topology: v5e:2x2
jax: 0.10.0
libtpu: 0.0.40
codegen_flags: <defaults>
</compile_context>

<pallas_src>
import functools
import math

import jax
import jax.numpy as jnp
from jax.experimental import pallas as pl
from jax.experimental.pallas import tpu as pltpu


# ---------------------------------------------------------------------------
# Parameter setup (glue): sinusoidal table, exactly like PyTorch __init__.
# ---------------------------------------------------------------------------
def make_pe_table(d_model, max_len=5000, dtype=jnp.float32):
    position = jnp.arange(max_len, dtype=jnp.float32)[:, None]            # (L, 1)
    div_term = jnp.exp(
        jnp.arange(0, d_model, 2, dtype=jnp.float32)
        * (-math.log(10000.0) / d_model))                                 # (D/2,)
    pe = jnp.zeros((max_len, d_model), jnp.float32)
    pe = pe.at[:, 0::2].set(jnp.sin(position * div_term))
    pe = pe.at[:, 1::2].set(jnp.cos(position * div_term))
    # unsqueeze(0).transpose(0, 1) -> (max_len, 1, d_model)
    return pe[:, None, :].astype(dtype)


# ---------------------------------------------------------------------------
# Pallas kernels (shape-agnostic: (bs,B,D)+(bs,1,D) or (bs,B*D)+(bs,B*D))
# ---------------------------------------------------------------------------
def _add_pe_kernel(x_ref, pe_ref, o_ref):
    o_ref[...] = (x_ref[...] + pe_ref[...]).astype(o_ref.dtype)


def _add_pe_dropout_kernel(x_ref, pe_ref, m_ref, o_ref, *, inv_keep):
    # m_ref holds a 0/1 keep-mask in x's dtype (generated in the wrapper).
    y = (x_ref[...] + pe_ref[...]) * m_ref[...] * inv_keep
    o_ref[...] = y.astype(o_ref.dtype)


# ---------------------------------------------------------------------------
# Tiling: largest seq-block that fits a generation-safe VMEM budget.
# Live VMEM per grid step ~= double-buffered sum of all streamed blocks.
# 20 MiB live with a 32 MiB scoped limit is safe on v5e/v6e (128 MiB VMEM)
# and on v7x (64 MiB VMEM per TensorCore).
# ---------------------------------------------------------------------------
_BLOCK_VMEM_BUDGET = 20 * 1024 * 1024
_VMEM_LIMIT_BYTES = 32 * 1024 * 1024


def _choose_block_s(S, row_bytes_total, budget=_BLOCK_VMEM_BUDGET):
    per_row = 2 * row_bytes_total                    # double-buffered
    rows = int(budget // max(per_row, 1))
    if rows >= S:
        return S
    return min(max(8, (rows // 8) * 8), S)


# ---------------------------------------------------------------------------
# Wrapper (forward of PositionalEncoding)
# ---------------------------------------------------------------------------
def positional_encoding(x, pe_table, *, dropout_p=0.1, deterministic=True,
                        rng_key=None):
    """x: (S, B, D) float array.  pe_table: (max_len, 1, D)."""
    S, B, D = x.shape
    dtype = x.dtype
    itemsize = jnp.dtype(dtype).itemsize
    pe = pe_table[:S].astype(dtype)                  # (S, 1, D), match x dtype

    training = (not deterministic) and float(dropout_p) > 0.0
    if training and rng_key is None:
        rng_key = jax.random.PRNGKey(0)

    if D % 128 == 0:
        # Already lane-dense; keep the broadcast so the pe HBM stream is x/B.
        x_in, pe_in = x, pe
        row_x, row_pe = B * D * itemsize, D * itemsize
        row_total = 2 * row_x + row_pe + (row_x if training else 0)
        block_s = _choose_block_s(S, row_total)
        x_spec = pl.BlockSpec((block_s, B, D), lambda i: (i, 0, 0))
        pe_spec = pl.BlockSpec((block_s, 1, D), lambda i: (i, 0, 0))
        o_spec = pl.BlockSpec((block_s, B, D), lambda i: (i, 0, 0))
        m_spec = x_spec
        mask_shape = (S, B, D)
        out_shape = jax.ShapeDtypeStruct((S, B, D), dtype)
        unflatten = lambda o: o
    else:
        # Small / ragged d_model: flatten (B, D) into the lane dim so output
        # stores are wide unmasked vst; pe is tiled across batch once.
        # TODO(synk): for tiny B this could instead compute the sinusoid
        # in-kernel (EUP) and drop the pe HBM stream entirely.
        x_in = x.reshape(S, B * D)
        pe_in = jnp.tile(pe[:, 0, :], (1, B))        # (S, B*D)
        row_x = row_pe = B * D * itemsize
        row_total = 2 * row_x + row_pe + (row_x if training else 0)
        block_s = _choose_block_s(S, row_total)
        x_spec = pl.BlockSpec((block_s, B * D), lambda i: (i, 0))
        pe_spec = pl.BlockSpec((block_s, B * D), lambda i: (i, 0))
        o_spec = pl.BlockSpec((block_s, B * D), lambda i: (i, 0))
        m_spec = x_spec
        mask_shape = (S, B * D)
        out_shape = jax.ShapeDtypeStruct((S, B * D), dtype)
        unflatten = lambda o: o.reshape(S, B, D)

    grid = (pl.cdiv(S, block_s),)
    per_step_live = 2 * block_s * row_total
    compiler_params = pltpu.CompilerParams(
        dimension_semantics=("parallel",),           # seq blocks independent
        vmem_limit_bytes=max(_VMEM_LIMIT_BYTES, int(per_step_live * 5 // 4)),
    )

    if not training:
        # Eval-mode dropout is the identity.
        out = pl.pallas_call(
            _add_pe_kernel,
            out_shape=out_shape,
            grid=grid,
            in_specs=[x_spec, pe_spec],
            out_specs=o_spec,
            compiler_params=compiler_params,
        )(x_in, pe_in)
        return unflatten(out)

    # Training-mode dropout.  Keep-mask generated with jax.random in the
    # wrapper (portable: runs on TPU and under interpret); scaling semantics
    # match nn.Dropout.
    # TODO(synk): does not reproduce torch's RNG stream.
    p = float(dropout_p)
    keep = jax.random.bernoulli(rng_key, 1.0 - p, mask_shape).astype(dtype)
    out = pl.pallas_call(
        functools.partial(_add_pe_dropout_kernel, inv_keep=1.0 / (1.0 - p)),
        out_shape=out_shape,
        grid=grid,
        in_specs=[x_spec, pe_spec, m_spec],
        out_specs=o_spec,
        compiler_params=compiler_params,
    )(x_in, pe_in, keep)
    return unflatten(out)


# ---------------------------------------------------------------------------
# Demo / correctness check
# ---------------------------------------------------------------------------
if __name__ == "__main__":
    key = jax.random.PRNGKey(0)
    k1, k2, k3 = jax.random.split(key, 3)

    # Case 1: d_model not a multiple of 128 -> flattened lane-dense path.
    S, B, D = 8, 2, 64
    x = jax.random.normal(k1, (S, B, D), dtype=jnp.float32)
    pe_table = make_pe_table(d_model=D, max_len=5000)

    out = jax.block_until_ready(
        positional_encoding(x, pe_table, deterministic=True))
    ref = x + pe_table[:S]
    assert out.shape == (S, B, D)
    assert jnp.allclose(out, ref, atol=1e-6, rtol=1e-6)

    # Case 2: d_model multiple of 128 -> 3-D broadcast path (pe stream = x/B).
    S2, B2, D2 = 16, 2, 128
    x2 = jax.random.normal(k2, (S2, B2, D2), dtype=jnp.float32)
    pe_table2 = make_pe_table(d_model=D2, max_len=5000)
    out2 = jax.block_until_ready(
        positional_encoding(x2, pe_table2, deterministic=True))
    ref2 = x2 + pe_table2[:S2]
    assert jnp.allclose(out2, ref2, atol=1e-6, rtol=1e-6)

    # Case 3: training-mode dropout (keep-prob / scaling semantics check).
    p = 0.1
    out_d = jax.block_until_ready(
        positional_encoding(x, pe_table, dropout_p=p, deterministic=False,
                            rng_key=k3))
    y_full = (x + pe_table[:S]) / (1.0 - p)
    kept = out_d != 0.0
    assert jnp.allclose(jnp.where(kept, out_d, 0.0),
                        jnp.where(kept, y_full, 0.0), atol=1e-5, rtol=1e-5)
    keep_frac = float(jnp.mean(kept.astype(jnp.float32)))
    assert 0.7 < keep_frac < 0.995

    print("KERNEL_OK")
</pallas_src>

<mosaic_0001>
module attributes {stable_mosaic.version = 11 : i64} {
  func.func @_add_pe_kernel(%arg0: i32, %arg1: memref<8x128xf32, #tpu.memory_space<vmem>>, %arg2: memref<8x128xf32, #tpu.memory_space<vmem>>, %arg3: memref<8x128xf32, #tpu.memory_space<vmem>>) attributes {dimension_semantics = [#tpu.dimension_semantics<parallel>], iteration_bounds = array<i64: 1>, scalar_prefetch = 0 : i64, scratch_operands = 0 : i64, tpu.core_type = #tpu.core_type<tc>, window_params = [{transform_indices = @transform_0, window_bounds = array<i64: 8, 128>}, {transform_indices = @transform_1, window_bounds = array<i64: 8, 128>}, {transform_indices = @transform_2, window_bounds = array<i64: 8, 128>}]} {
    %c0 = arith.constant 0 : index
    %c0_0 = arith.constant 0 : index
    %0 = vector.load %arg1[%c0, %c0_0] : memref<8x128xf32, #tpu.memory_space<vmem>>, vector<8x128xf32>
    %c0_1 = arith.constant 0 : index
    %c0_2 = arith.constant 0 : index
    %1 = vector.load %arg2[%c0_1, %c0_2] : memref<8x128xf32, #tpu.memory_space<vmem>>, vector<8x128xf32>
    %2 = arith.addf %0, %1 : vector<8x128xf32>
    %c0_3 = arith.constant 0 : index
    %c0_4 = arith.constant 0 : index
    %3 = vector.load %arg3[%c0_3, %c0_4] : memref<8x128xf32, #tpu.memory_space<vmem>>, vector<8x128xf32>
    tpu.vector_store %arg3[%c0_3, %c0_4], %2 {strides = array<i32>} : memref<8x128xf32, #tpu.memory_space<vmem>>, vector<8x128xf32>,
    return
  }
  func.func @transform_0(%arg0: i32) -> (i32, i32) {
    %c0_i32 = arith.constant 0 : i32
    %c0_i32_0 = arith.constant 0 : i32
    return %arg0, %c0_i32 : i32, i32
  }
  func.func @transform_1(%arg0: i32) -> (i32, i32) {
    %c0_i32 = arith.constant 0 : i32
    %c0_i32_0 = arith.constant 0 : i32
    return %arg0, %c0_i32 : i32, i32
  }
  func.func @transform_2(%arg0: i32) -> (i32, i32) {
    %c0_i32 = arith.constant 0 : i32
    %c0_i32_0 = arith.constant 0 : i32
    return %arg0, %c0_i32 : i32, i32
  }
}

</mosaic_0001>

<bundles_post_ra>
// kernel: tpu_custom_call.1
= control target key start
LH: loop header
LB: loop body
LE: loop exit
PB: predicated region body
PF: predicated region fallthrough
CT: control target
= control target key end

     0   :  { %7 = vsyncpa [#allocation3], 0  ;;  %s170_s0 = inlined_call_operand.hbm [shape: f32[8,128], index: 0, kind: input, shape index: {}]   ;;  %s171_s1 = inlined_call_operand.hbm [shape: f32[8,128], index: 1, kind: input, shape index: {}]   ;;  %s172_s2 = inlined_call_operand.hbm [shape: f32[8,128], index: 2, kind: output, shape index: {}]  }
   0x1   :  { %8 = vsyncpa [#allocation6], 0 }
   0x2   :  { %9 = vsyncpa [#allocation4], 0  ;;  %s15_s11 = sshll.u32 %s170_s0, 4  ;;  %s143_s12 = smov [#allocation2]   ;;  %s16_s11 = int_to_ptr.hbm [resolvable:$true] %s15_s11 }
   0x3   :  { %s17_s13 = sshll.u32 %s143_s12, 4  ;;  %s26_s16 = sshll.u32 %s171_s1, 4  ;;  %s18_s13 = int_to_ptr.vmem [resolvable:$true] %s17_s13  ;;  %s27_s16 = int_to_ptr.hbm [resolvable:$true] %s26_s16 }
   0x4   :  { %20 = dma.hbm_to_vmem [thread:$0]  %s16_s11, 128, %s18_s13, [#allocation3]  }
   0x5   :  { %s144_s17 = smov [#allocation5]  }
   0x6   :  { %s28_s18 = sshll.u32 %s144_s17, 4  ;;  %s29_s18 = int_to_ptr.vmem [resolvable:$true] %s28_s18 }
   0x7   :  { %31 = dma.hbm_to_vmem [thread:$0]  %s27_s16, 128, %s29_s18, [#allocation6]  }
   0x8   :  { %137 = dma.done.wait [#allocation3], 128  }
   0x9   :  { %138 = vsyncadd [#allocation3], 4294967168 }
   0xa   :  { %139 = dma.done.wait [#allocation6], 128  }
   0xb   :  { %140 = vsyncadd [#allocation6], 4294967168  ;;  %s145_s19 = smov [#allocation7]   ;;  %s51_s22 = sshll.u32 %s172_s2, 4  ;;  %v40_v0 = vld [vmem:[#allocation2] sm:$0xff]  ;;  %v41_v1 = vld [vmem:[#allocation5] sm:$0xff]  ;;  %s52_s22 = int_to_ptr.hbm [resolvable:$true] %s51_s22 }
   0xc   :  { %s49_s0 = sshll.u32 %s145_s19, 4  ;;  %v42_v2 = vadd.f32 %v41_v1, %v40_v0  ;;  %s50_s0 = int_to_ptr.vmem [resolvable:$true] %s49_s0 }
   0xe   :  { %43 = vst [vmem:[#allocation7] sm:$0xff] %v42_v2 }
   0xf   :  { %54 = dma.vmem_to_hbm [thread:$0]  %s50_s0, 128, %s52_s22, [#allocation4]  }
  0x10   :  { %141 = dma.done.wait [#allocation4], 128  }
  0x11   :  { %142 = vsyncadd [#allocation4], 4294967168 }
  0x12   :  { %59 = vsyncpa [#allocation3], 1 }
  0x13   :  { %60 = vsyncpa [#allocation6], 1 }
  0x14   :  { %61 = vsyncpa [#allocation4], 1 }

</bundles_post_ra>
